<compile_context>
chip_gen: v6e
topology: v6e:2x2x1
jax: 0.10.0
libtpu: 0.0.40
codegen_flags: <defaults>
</compile_context>

<pallas_src>
import math
import functools

import jax
import jax.numpy as jnp
from jax.experimental import pallas as pl
from jax.experimental.pallas import tpu as pltpu


_LANE = 128
_MAX_TN = 2048                         # lane-dense feature-tile cap


@functools.lru_cache(maxsize=1)
def _device_params():
    """(vmem_limit_bytes, tile_set_budget_bytes, force_multi_block)."""
    vmem = None
    try:
        vmem = int(pltpu.get_tpu_info().vmem_capacity_bytes)
    except Exception:
        vmem = None
    if vmem is not None and vmem >= 96 * 1024 * 1024:
        # v5e / v6e: 128 MiB VMEM, single TensorCore -> bigger tiles, no forced split.
        return 64 * 1024 * 1024, 24 * 1024 * 1024, False
    # v7x (64 MiB VMEM, 2 TensorCores) or unknown: conservative budgets, split grid.
    return 32 * 1024 * 1024, 12 * 1024 * 1024, True


def _as_set(v):
    """`.bool()` semantics for any mask dtype."""
    return v if v.dtype == jnp.bool_ else (v != 0)


def _sht_plain_kernel(x_ref, o_ref, *, scale, min_val, max_val):
    o_ref[...] = (scale * jnp.clip(x_ref[...], min_val, max_val)).astype(o_ref.dtype)


def _sht_eff_kernel(x_ref, eff_ref, o_ref, *, scale, min_val, max_val):
    x = jnp.where(_as_set(eff_ref[...]), 0.0, x_ref[...])
    o_ref[...] = (scale * jnp.clip(x, min_val, max_val)).astype(o_ref.dtype)


def _sht_rowmask_kernel(x_ref, m_ref, f_ref, o_ref, *, scale, min_val, max_val):
    eff = _as_set(m_ref[...]) & _as_set(f_ref[...])     # (TB, TN) & (TB, 1) broadcast
    x = jnp.where(eff, 0.0, x_ref[...])
    o_ref[...] = (scale * jnp.clip(x, min_val, max_val)).astype(o_ref.dtype)


def _flat_shape(total):
    """Largest lane-dense column count (multiple of 128, <= _MAX_TN) dividing `total`."""
    cols = _LANE
    while cols * 2 <= _MAX_TN and total % (cols * 2) == 0:
        cols *= 2
    return total // cols, cols


def _choose_tiles(B, N, x_bytes, extra_bytes, tile_budget, multi_tc):
    """Pick (TB, TN): multi-MiB tiles inside the VMEM budget, lane-dense when possible."""
    if N % _LANE == 0:
        TN = min(N, _MAX_TN)
    else:
        TN = N                                          # full-extent block (always legal)

    bpe = 2 * x_bytes + extra_bytes                     # x in + out (+ 1-byte mask/eff)
    tb_cap = max(1, tile_budget // max(1, TN * bpe))

    # Sublane alignment: 8 for f32, 16 for bf16, 32 when a 1-byte mask rides along.
    align = 32 if extra_bytes else max(8, 32 // max(1, x_bytes))

    TB = min(B, tb_cap)
    if TB >= align:
        TB = (TB // align) * align
        if multi_tc and B > align:
            # Keep >= 2 row blocks so both v7x TensorCores get work.
            half = -(-((B + 1) // 2) // align) * align  # ceil(B/2) rounded up to align
            TB = min(TB, max(align, half))
    else:
        TB = min(B, align)                              # small batch: full-extent rows

    # v7x: guarantee >= 2 grid blocks even when the batch can't be split.
    if multi_tc and pl.cdiv(B, TB) * pl.cdiv(N, TN) <= 1:
        if TN > _LANE and TN % (2 * _LANE) == 0:
            TN //= 2
        elif TB > 8 and TB % 16 == 0:
            TB //= 2
    return TB, TN


def _pallas_elementwise(kernel, x2d, tile_extras, row_extras, *, scale, min_val,
                        max_val, vmem_limit, tile_budget, multi_tc):
    B, N = x2d.shape
    x_bytes = jnp.dtype(x2d.dtype).itemsize
    extra_bytes = sum(jnp.dtype(a.dtype).itemsize for a in tile_extras)
    TB, TN = _choose_tiles(B, N, x_bytes, extra_bytes, tile_budget, multi_tc)

    grid = (pl.cdiv(B, TB), pl.cdiv(N, TN))
    tile_spec = pl.BlockSpec((TB, TN), lambda i, j: (i, j))
    row_spec = pl.BlockSpec((TB, 1), lambda i, j: (i, 0))
    in_specs = [tile_spec] * (1 + len(tile_extras)) + [row_spec] * len(row_extras)

    bytes_accessed = B * N * (2 * x_bytes + extra_bytes)
    for r in row_extras:
        bytes_accessed += r.size * jnp.dtype(r.dtype).itemsize
    cost = pl.CostEstimate(flops=3 * B * N, transcendentals=0,
                           bytes_accessed=int(bytes_accessed))

    return pl.pallas_call(
        functools.partial(kernel, scale=scale, min_val=min_val, max_val=max_val),
        out_shape=jax.ShapeDtypeStruct((B, N), x2d.dtype),
        grid_spec=pl.GridSpec(grid=grid, in_specs=in_specs, out_specs=tile_spec),
        compiler_params=pltpu.CompilerParams(
            dimension_semantics=("parallel", "parallel"),
            vmem_limit_bytes=vmem_limit),
        cost_estimate=cost,
    )(x2d, *tile_extras, *row_extras)


def scaled_hardtanh(x, mask=None, *, scale=math.pi, min_val=-1.0, max_val=1.0):
    """Pallas implementation of ScaledHardTanh.forward(x, mask)."""
    if x.ndim < 2:
        x = x.reshape(1, -1)               # matches x_.unsqueeze_(0)
        if mask is not None:
            mask = mask.reshape(1, -1)
    # TODO(synk): inputs with ndim > 2 would need their leading dims collapsed first.

    B, N = x.shape
    vmem_limit, tile_budget, multi_tc = _device_params()
    lane_dense = (N % _LANE == 0)
    can_flatten = (not lane_dense) and ((B * N) % _LANE == 0)
    run = functools.partial(_pallas_elementwise, scale=scale, min_val=min_val,
                            max_val=max_val, vmem_limit=vmem_limit,
                            tile_budget=tile_budget, multi_tc=multi_tc)

    if mask is None:
        if can_flatten:
            rows, cols = _flat_shape(B * N)
            out = run(_sht_plain_kernel, x.reshape(rows, cols), [], [])
            return out.reshape(B, N)
        return run(_sht_plain_kernel, x, [], [])

    # fixed = (mask.sum(-1) == 1), computed over the true (B, N) mask so tile
    # padding can never leak into the reduction.  The sum uses the original
    # (non-bool) dtype, matching the PyTorch module's `m.sum(-1) == 1`.
    m_sum = mask.astype(jnp.int32) if mask.dtype == jnp.bool_ else mask
    fixed = jnp.sum(m_sum, axis=-1, keepdims=True) == 1           # (B, 1) bool

    if can_flatten:
        # Pre-combine eff, flatten to a lane-dense slab -> unmasked full-lane stores.
        eff_i8 = ((mask != 0) & fixed).astype(jnp.int8)           # fused, no extra pass
        rows, cols = _flat_shape(B * N)
        out = run(_sht_eff_kernel, x.reshape(rows, cols),
                  [eff_i8.reshape(rows, cols)], [])
        return out.reshape(B, N)

    # Lane-dense (or un-flattenable) path: stream the mask as-is when it is
    # already 1 byte/elem; only wide masks (int32 / float) get repacked to int8.
    if jnp.dtype(mask.dtype).itemsize == 1:
        m_in = mask
    else:
        m_in = (mask != 0).astype(jnp.int8)
    fixed_i8 = fixed.astype(jnp.int8)
    return run(_sht_rowmask_kernel, x, [m_in], [fixed_i8])


def _reference(x, mask, scale=math.pi, min_val=-1.0, max_val=1.0):
    """Pure-JAX reference mirroring the PyTorch module."""
    if x.ndim < 2:
        x = x.reshape(1, -1)
        if mask is not None:
            mask = mask.reshape(1, -1)
    if mask is not None:
        m_sum = mask.astype(jnp.int32) if mask.dtype == jnp.bool_ else mask
        fixed = m_sum.sum(-1, keepdims=True) == 1
        eff = (mask != 0) & fixed
        x = jnp.where(eff, 0.0, x)
    return scale * jnp.clip(x, min_val, max_val)


if __name__ == "__main__":
    key = jax.random.PRNGKey(0)
    keys = jax.random.split(key, 9)

    cases = []
    # 1) lane-dense batch, bool mask streamed directly into the kernel.
    B1, N1 = 8, 128
    x1 = jax.random.normal(keys[0], (B1, N1), dtype=jnp.float32) * 2.0
    m1 = jax.random.uniform(keys[1], (B1, N1)) < 0.02
    cases.append((x1, m1))
    # 2) no mask.
    cases.append((x1, None))
    # 3) larger batch -> multi-block 2-D grid with a partial edge block.
    B2, N2 = 48, 256
    x2 = jax.random.normal(keys[2], (B2, N2), dtype=jnp.float32) * 2.0
    m2 = jax.random.uniform(keys[3], (B2, N2)) < 0.01
    cases.append((x2, m2))
    # 4) 1-D input, N not a multiple of 128 (unsqueeze path, full-extent blocks).
    N3 = 64
    x3 = jax.random.normal(keys[4], (N3,), dtype=jnp.float32) * 2.0
    m3 = jax.random.uniform(keys[5], (N3,)) < 0.03
    cases.append((x3, m3))
    # 5) N % 128 != 0 but B*N % 128 == 0 -> eff-precombine + lane-dense flatten.
    B4, N4 = 16, 96
    x4 = jax.random.normal(keys[6], (B4, N4), dtype=jnp.float32) * 2.0
    m4 = jax.random.uniform(keys[7], (B4, N4)) < 0.05
    cases.append((x4, m4))
    cases.append((x4, None))
    # 6) wide (int32) mask -> repacked to int8 in the wrapper.
    m5 = (jax.random.uniform(keys[8], (B1, N1)) < 0.02).astype(jnp.int32)
    cases.append((x1, m5))

    outs = [scaled_hardtanh(x, m) for x, m in cases]
    jax.block_until_ready(outs)

    for (x, m), o in zip(cases, outs):
        r = _reference(x, m)
        assert o.shape == r.shape, f"shape mismatch {o.shape} vs {r.shape}"
        assert jnp.allclose(o, r, atol=1e-6), "kernel/reference mismatch"

    print("KERNEL_OK")
</pallas_src>

<mosaic_0001>
module attributes {stable_mosaic.version = 11 : i64} {
  func.func @_sht_rowmask_kernel(%arg0: i32, %arg1: i32, %arg2: memref<8x128xf32, #tpu.memory_space<vmem>>, %arg3: memref<8x128xi32, #tpu.memory_space<vmem>>, %arg4: memref<8x1xi8, #tpu.memory_space<vmem>>, %arg5: memref<8x128xf32, #tpu.memory_space<vmem>>) attributes {dimension_semantics = [#tpu.dimension_semantics<parallel>, #tpu.dimension_semantics<parallel>], iteration_bounds = array<i64: 1, 1>, scalar_prefetch = 0 : i64, scratch_operands = 0 : i64, tpu.core_type = #tpu.core_type<tc>, window_params = [{transform_indices = @transform_0, window_bounds = array<i64: 8, 128>}, {transform_indices = @transform_1, window_bounds = array<i64: 8, 128>}, {transform_indices = @transform_2, window_bounds = array<i64: 8, 1>}, {transform_indices = @transform_3, window_bounds = array<i64: 8, 128>}]} {
    %c0 = arith.constant 0 : index
    %c0_0 = arith.constant 0 : index
    %0 = vector.load %arg3[%c0, %c0_0] : memref<8x128xi32, #tpu.memory_space<vmem>>, vector<8x128xi32>
    %cst = arith.constant dense<0> : vector<8x128xi32>
    %1 = arith.cmpi ne, %0, %cst : vector<8x128xi32>
    %c0_1 = arith.constant 0 : index
    %c0_2 = arith.constant 0 : index
    %2 = vector.load %arg4[%c0_1, %c0_2] : memref<8x1xi8, #tpu.memory_space<vmem>>, vector<8x1xi8>
    %c0_i8 = arith.constant 0 : i8
    %3 = vector.broadcast %c0_i8 : i8 to vector<8x1xi8>
    %4 = arith.cmpi ne, %2, %3 : vector<8x1xi8>
    %5 = vector.broadcast %4 : vector<8x1xi1> to vector<8x128xi1>
    %6 = arith.andi %1, %5 : vector<8x128xi1>
    %c0_3 = arith.constant 0 : index
    %c0_4 = arith.constant 0 : index
    %7 = vector.load %arg2[%c0_3, %c0_4] : memref<8x128xf32, #tpu.memory_space<vmem>>, vector<8x128xf32>
    %cst_5 = arith.constant 0.000000e+00 : f32
    %8 = vector.broadcast %cst_5 : f32 to vector<8x128xf32>
    %9 = arith.select %6, %8, %7 : vector<8x128xi1>, vector<8x128xf32>
    %cst_6 = arith.constant -1.000000e+00 : f32
    %cst_7 = arith.constant 1.000000e+00 : f32
    %10 = vector.broadcast %cst_6 : f32 to vector<8x128xf32>
    %11 = arith.maximumf %10, %9 : vector<8x128xf32>
    %12 = vector.broadcast %cst_7 : f32 to vector<8x128xf32>
    %13 = arith.minimumf %12, %11 : vector<8x128xf32>
    %cst_8 = arith.constant 3.14159274 : f32
    %14 = vector.broadcast %cst_8 : f32 to vector<8x128xf32>
    %15 = arith.mulf %14, %13 : vector<8x128xf32>
    %c0_9 = arith.constant 0 : index
    %c0_10 = arith.constant 0 : index
    %16 = vector.load %arg5[%c0_9, %c0_10] : memref<8x128xf32, #tpu.memory_space<vmem>>, vector<8x128xf32>
    tpu.vector_store %arg5[%c0_9, %c0_10], %15 {strides = array<i32>} : memref<8x128xf32, #tpu.memory_space<vmem>>, vector<8x128xf32>,
    return
  }
  func.func @transform_0(%arg0: i32, %arg1: i32) -> (i32, i32) {
    %c0_i32 = arith.constant 0 : i32
    return %arg0, %arg1 : i32, i32
  }
  func.func @transform_1(%arg0: i32, %arg1: i32) -> (i32, i32) {
    %c0_i32 = arith.constant 0 : i32
    return %arg0, %arg1 : i32, i32
  }
  func.func @transform_2(%arg0: i32, %arg1: i32) -> (i32, i32) {
    %c0_i32 = arith.constant 0 : i32
    %c0_i32_0 = arith.constant 0 : i32
    return %arg0, %c0_i32 : i32, i32
  }
  func.func @transform_3(%arg0: i32, %arg1: i32) -> (i32, i32) {
    %c0_i32 = arith.constant 0 : i32
    return %arg0, %arg1 : i32, i32
  }
}

</mosaic_0001>

<bundles_post_ra>
// kernel: tpu_custom_call.1
= control target key start
LH: loop header
LB: loop body
LE: loop exit
PB: predicated region body
PF: predicated region fallthrough
CT: control target
= control target key end

     0   :  { %s110_s0 = inlined_call_operand.vmem [shape: f32[8,128], index: 0, kind: input, shape index: {}]   ;;  %s111_s1 = inlined_call_operand.vmem [shape: s32[8,128], index: 1, kind: input, shape index: {}]   ;;  %s112_s2 = inlined_call_operand.vmem [shape: s8[8,1], index: 2, kind: input, shape index: {}]   ;;  %s113_s3 = inlined_call_operand.hbm [shape: f32[8,128], index: 3, kind: output, shape index: {}]  }
   0x1   :  { %v19_v0 = vld [vmem:[%s112_s2] sm:$0x3] }
   0x2   :  { %8 = vsyncpa [#allocation3], 0  ;;  %v76_v1 = vmov 0   ;;  %vm20_vm0 = vnez %v19_v0  ;;  %v17_v5 = vld [vmem:[%s111_s1] sm:$0xff]  ;;  %s77_s2 = smov [#allocation2]  }
   0x3   :  { %53 = vset.pattern.permute.xlu0 %v76_v1  ;;  %v21_v2 = vsel %vm20_vm0, 16843009, %v76_v1  ;;  %vm18_vm2 = vcmp.ne.s32.totalorder %v17_v5, 0  ;;  %v30_v6 = vld [vmem:[%s110_s0] sm:$0xff]  ;;  %s42_s18 = sshll.u32 %s77_s2, 4  ;;  %s43_s18 = int_to_ptr.vmem [resolvable:$true] %s42_s18 }
   0x4   :  { %v22_v3 = vunpack.c.0.s8 %v21_v2  ;;  %s54_s19 = scalar_lea.vmem %s43_s18, 128  ;;  %p59_p1 = scmp.lt.s32.totalorder %s43_s18, %s43_s18 }
   0x5   :  { %p55_p0 = scmp.ne.s32.totalorder %s43_s18, %s54_s19  ;;  %p60_p2 = scmp.lt.s32.totalorder %s54_s19, %s54_s19 }
   0x6   :  { %vm23_vm1 = vcmp.ne.s32.totalorder %v22_v3, 0 }
   0x7   :  { %v24_v4 = vsel %vm23_vm1, 1, %v76_v1  ;;  %p61_p3 = por %p60_p2, %p59_p1 }
   0x8   :  { %26 = vperm.xlu0 %53, %v24_v4  }
   0x9   :  { %p62_p4 = pnand %p61_p3, %p55_p0 }
  0x83   :  { %v27_v7 = vpop.permute.xlu0 %26 }
  0x84   :  { %vm28_vm3 = vcmp.eq.s32.totalorder %v27_v7, 1 }
  0x85   :  { %vm29_vm4 = vmand %vm18_vm2, %vm28_vm3 }
  0x86   :  { %v31_v8 = vsel %vm29_vm4, 0.0, %v30_v6 }
  0x87   :  { %v50_v9 = vclamps-f32 %v31_v8, 1.0 }
  0x89   :  { %v34_v10 = vmul.f32 3.1415927, %v50_v9 }
  0x8b   :  { %35 = vst [vmem:[#allocation2] sm:$0xff] %v34_v10 }
  0x8c   :  { %65 = shalt.err (!%p62_p4)
}
  0x8d   :  { %45 = dma.vmem_to_hbm [thread:$0]  %s43_s18, 128, %s113_s3, [#allocation3]  }
  0x8e   :  { %74 = dma.done.wait [#allocation3], 128  }
  0x8f   :  { %75 = vsyncadd [#allocation3], 4294967168 }
  0x90   :  { %49 = vsyncpa [#allocation3], 1 }

</bundles_post_ra>
